<compile_context>
chip_gen: v6e
topology: v6e:2x2x1
jax: 0.10.0
libtpu: 0.0.40
codegen_flags: <defaults>
</compile_context>

<pallas_src>
import functools

import jax
import jax.numpy as jnp
from jax import lax
from jax.experimental import pallas as pl
from jax.experimental.pallas import tpu as pltpu


def _pconv_kernel(w_ref, x_ref, o_ref, *, dim_conv, dim_last, ksize, H, W):
    """Single-step kernel (empty grid): processes the full (B, C, H*W) block.

    w_ref : (dim_last*dim_last*ksize*ksize,) flat conv weights in SMEM (OIHW order).
    x_ref : (B, C, H*W) input in VMEM, spatial dims flattened onto the lane axis.
    o_ref : (B, C, H*W) output in VMEM.
    """
    B = x_ref.shape[0]
    HW = H * W
    pad = (ksize - 1) // 2
    c_pass = 2 * dim_conv  # channels that pass through untouched

    # 1) identity channels: one lane-dense copy.
    if c_pass > 0:
        o_ref[:, :c_pass, :] = x_ref[:, :c_pass, :].astype(o_ref.dtype)

    # 2) hoist all conv-weight scalar loads (SMEM) out of the vector tap loop.
    def widx(co, ci, kh, kw):
        return ((co * dim_last + ci) * ksize + kh) * ksize + kw

    wv = [[[[w_ref[widx(co, ci, kh, kw)]
             for kw in range(ksize)]
            for kh in range(ksize)]
           for ci in range(dim_last)]
          for co in range(dim_last)]

    # 3) per-tap border masks, built once from the flattened-position iota.
    #    p = h*W + w ; a tap (dh, dw) is valid iff 0 <= h+dh < H and 0 <= w+dw < W.
    pidx = lax.broadcasted_iota(jnp.int32, (B, HW), 1)
    col = pidx % W
    masks = {}
    for kh in range(ksize):
        for kw in range(ksize):
            dh, dw = kh - pad, kw - pad
            conds = []
            if dh < 0:
                conds.append(pidx >= (-dh) * W)
            if dh > 0:
                conds.append(pidx < (H - dh) * W)
            if dw < 0:
                conds.append(col >= -dw)
            if dw > 0:
                conds.append(col < W - dw)
            m = None
            for c in conds:
                m = c if m is None else jnp.logical_and(m, c)
            masks[(dh, dw)] = m  # None => centre tap, no masking needed

    # 4) conv channels: lane-roll taps (XLU) + scalar*tile FMAs (VPU), f32 acc.
    x3 = x_ref[:, c_pass:, :].astype(jnp.float32)          # (B, dim_last, HW)
    accs = [jnp.zeros((B, HW), jnp.float32) for _ in range(dim_last)]
    for ci in range(dim_last):
        xc = x3[:, ci, :]                                   # (B, HW)
        for kh in range(ksize):
            for kw in range(ksize):
                dh, dw = kh - pad, kw - pad
                d = dh * W + dw                  # output[p] reads input[p + d]
                if d != 0:
                    sh = pltpu.roll(xc, shift=(-d) % HW, axis=1)
                else:
                    sh = xc
                m = masks[(dh, dw)]
                if m is not None:
                    sh = jnp.where(m, sh, 0.0)   # zero taps that cross the border
                for co in range(dim_last):
                    accs[co] = accs[co] + wv[co][ci][kh][kw] * sh

    out3 = jnp.stack(accs, axis=1)                          # (B, dim_last, HW)
    o_ref[:, c_pass:, :] = out3.astype(o_ref.dtype)


def pconv3_3_pallas(x, conv_weight, *, n_div=3, kernel_size=3):
    """x: (B, C, H, W). conv_weight: (dim_last, dim_last, k, k) in PyTorch OIHW layout."""
    B, C, H, W = x.shape
    dim_conv = C // n_div
    dim_last = C - 2 * dim_conv
    assert conv_weight.shape == (dim_last, dim_last, kernel_size, kernel_size)

    # Lane-dense spatial layout: put H*W on the last (lane) axis.
    x2d = x.reshape(B, C, H * W)
    w_flat = conv_weight.reshape(-1).astype(jnp.float32)    # OIHW order, flat -> SMEM

    kernel = functools.partial(
        _pconv_kernel, dim_conv=dim_conv, dim_last=dim_last,
        ksize=kernel_size, H=H, W=W)

    out2d = pl.pallas_call(
        kernel,
        out_shape=jax.ShapeDtypeStruct((B, C, H * W), x.dtype),
        # No grid: the whole (tiny) batch is one block; removes per-step overhead.
        in_specs=[
            pl.BlockSpec(memory_space=pltpu.MemorySpace.SMEM),   # flat conv weights
            pl.BlockSpec(memory_space=pltpu.MemorySpace.VMEM),   # x, whole batch
        ],
        out_specs=pl.BlockSpec(memory_space=pltpu.MemorySpace.VMEM),
    )(w_flat, x2d)
    return out2d.reshape(B, C, H, W)


def pconv3_3_reference(x, conv_weight, *, n_div=3, kernel_size=3):
    """Pure-JAX replica of the PyTorch forward (for correctness checking)."""
    B, C, H, W = x.shape
    dim_conv = C // n_div
    x1 = x[:, :dim_conv]
    x2 = x[:, dim_conv:2 * dim_conv]
    x3 = x[:, 2 * dim_conv:]
    pad = (kernel_size - 1) // 2
    y3 = jax.lax.conv_general_dilated(
        x3, conv_weight,
        window_strides=(1, 1),
        padding=((pad, pad), (pad, pad)),
        dimension_numbers=("NCHW", "OIHW", "NCHW"),
        precision=jax.lax.Precision.HIGHEST)
    return jnp.concatenate([x1, x2, y3], axis=1)


if __name__ == "__main__":
    # Shapes consistent with the module: dim=4, n_div=3 -> dim_conv=1, dim_last=2.
    B, C, H, W = 2, 4, 16, 16
    N_DIV = 3
    KS = 3
    dim_conv = C // N_DIV
    dim_last = C - 2 * dim_conv

    key = jax.random.PRNGKey(0)
    k_x, k_w = jax.random.split(key)
    x = jax.random.normal(k_x, (B, C, H, W), dtype=jnp.float32)
    conv_w = 0.1 * jax.random.normal(k_w, (dim_last, dim_last, KS, KS), dtype=jnp.float32)

    out = pconv3_3_pallas(x, conv_w, n_div=N_DIV, kernel_size=KS)
    out = jax.block_until_ready(out)

    ref = pconv3_3_reference(x, conv_w, n_div=N_DIV, kernel_size=KS)
    assert out.shape == (B, C, H, W)
    assert jnp.allclose(out, ref, atol=1e-4, rtol=1e-4), "mismatch vs reference"

    print("KERNEL_OK")
</pallas_src>

<mosaic_0001>
module attributes {stable_mosaic.version = 11 : i64} {
  func.func @_pconv_kernel(%arg0: memref<36xf32, #tpu.memory_space<smem>>, %arg1: memref<2x4x256xf32, #tpu.memory_space<vmem>>, %arg2: memref<2x4x256xf32, #tpu.memory_space<vmem>>) attributes {dimension_semantics = [], scalar_prefetch = 0 : i64, scratch_operands = 0 : i64, tpu.core_type = #tpu.core_type<tc>} {
    %c0 = arith.constant 0 : index
    %c0_0 = arith.constant 0 : index
    %c0_1 = arith.constant 0 : index
    %0 = vector.load %arg1[%c0, %c0_0, %c0_1] : memref<2x4x256xf32, #tpu.memory_space<vmem>>, vector<2x2x256xf32>
    %c0_2 = arith.constant 0 : index
    %c0_3 = arith.constant 0 : index
    %c0_4 = arith.constant 0 : index
    %1 = vector.load %arg2[%c0_2, %c0_3, %c0_4] : memref<2x4x256xf32, #tpu.memory_space<vmem>>, vector<2x2x256xf32>
    tpu.vector_store %arg2[%c0_2, %c0_3, %c0_4], %0 {strides = array<i32>} : memref<2x4x256xf32, #tpu.memory_space<vmem>>, vector<2x2x256xf32>,
    %c0_5 = arith.constant 0 : index
    %2 = memref.load %arg0[%c0_5] : memref<36xf32, #tpu.memory_space<smem>>
    %c1 = arith.constant 1 : index
    %3 = memref.load %arg0[%c1] : memref<36xf32, #tpu.memory_space<smem>>
    %c2 = arith.constant 2 : index
    %4 = memref.load %arg0[%c2] : memref<36xf32, #tpu.memory_space<smem>>
    %c3 = arith.constant 3 : index
    %5 = memref.load %arg0[%c3] : memref<36xf32, #tpu.memory_space<smem>>
    %c4 = arith.constant 4 : index
    %6 = memref.load %arg0[%c4] : memref<36xf32, #tpu.memory_space<smem>>
    %c5 = arith.constant 5 : index
    %7 = memref.load %arg0[%c5] : memref<36xf32, #tpu.memory_space<smem>>
    %c6 = arith.constant 6 : index
    %8 = memref.load %arg0[%c6] : memref<36xf32, #tpu.memory_space<smem>>
    %c7 = arith.constant 7 : index
    %9 = memref.load %arg0[%c7] : memref<36xf32, #tpu.memory_space<smem>>
    %c8 = arith.constant 8 : index
    %10 = memref.load %arg0[%c8] : memref<36xf32, #tpu.memory_space<smem>>
    %c9 = arith.constant 9 : index
    %11 = memref.load %arg0[%c9] : memref<36xf32, #tpu.memory_space<smem>>
    %c10 = arith.constant 10 : index
    %12 = memref.load %arg0[%c10] : memref<36xf32, #tpu.memory_space<smem>>
    %c11 = arith.constant 11 : index
    %13 = memref.load %arg0[%c11] : memref<36xf32, #tpu.memory_space<smem>>
    %c12 = arith.constant 12 : index
    %14 = memref.load %arg0[%c12] : memref<36xf32, #tpu.memory_space<smem>>
    %c13 = arith.constant 13 : index
    %15 = memref.load %arg0[%c13] : memref<36xf32, #tpu.memory_space<smem>>
    %c14 = arith.constant 14 : index
    %16 = memref.load %arg0[%c14] : memref<36xf32, #tpu.memory_space<smem>>
    %c15 = arith.constant 15 : index
    %17 = memref.load %arg0[%c15] : memref<36xf32, #tpu.memory_space<smem>>
    %c16 = arith.constant 16 : index
    %18 = memref.load %arg0[%c16] : memref<36xf32, #tpu.memory_space<smem>>
    %c17 = arith.constant 17 : index
    %19 = memref.load %arg0[%c17] : memref<36xf32, #tpu.memory_space<smem>>
    %c18 = arith.constant 18 : index
    %20 = memref.load %arg0[%c18] : memref<36xf32, #tpu.memory_space<smem>>
    %c19 = arith.constant 19 : index
    %21 = memref.load %arg0[%c19] : memref<36xf32, #tpu.memory_space<smem>>
    %c20 = arith.constant 20 : index
    %22 = memref.load %arg0[%c20] : memref<36xf32, #tpu.memory_space<smem>>
    %c21 = arith.constant 21 : index
    %23 = memref.load %arg0[%c21] : memref<36xf32, #tpu.memory_space<smem>>
    %c22 = arith.constant 22 : index
    %24 = memref.load %arg0[%c22] : memref<36xf32, #tpu.memory_space<smem>>
    %c23 = arith.constant 23 : index
    %25 = memref.load %arg0[%c23] : memref<36xf32, #tpu.memory_space<smem>>
    %c24 = arith.constant 24 : index
    %26 = memref.load %arg0[%c24] : memref<36xf32, #tpu.memory_space<smem>>
    %c25 = arith.constant 25 : index
    %27 = memref.load %arg0[%c25] : memref<36xf32, #tpu.memory_space<smem>>
    %c26 = arith.constant 26 : index
    %28 = memref.load %arg0[%c26] : memref<36xf32, #tpu.memory_space<smem>>
    %c27 = arith.constant 27 : index
    %29 = memref.load %arg0[%c27] : memref<36xf32, #tpu.memory_space<smem>>
    %c28 = arith.constant 28 : index
    %30 = memref.load %arg0[%c28] : memref<36xf32, #tpu.memory_space<smem>>
    %c29 = arith.constant 29 : index
    %31 = memref.load %arg0[%c29] : memref<36xf32, #tpu.memory_space<smem>>
    %c30 = arith.constant 30 : index
    %32 = memref.load %arg0[%c30] : memref<36xf32, #tpu.memory_space<smem>>
    %c31 = arith.constant 31 : index
    %33 = memref.load %arg0[%c31] : memref<36xf32, #tpu.memory_space<smem>>
    %c32 = arith.constant 32 : index
    %34 = memref.load %arg0[%c32] : memref<36xf32, #tpu.memory_space<smem>>
    %c33 = arith.constant 33 : index
    %35 = memref.load %arg0[%c33] : memref<36xf32, #tpu.memory_space<smem>>
    %c34 = arith.constant 34 : index
    %36 = memref.load %arg0[%c34] : memref<36xf32, #tpu.memory_space<smem>>
    %c35 = arith.constant 35 : index
    %37 = memref.load %arg0[%c35] : memref<36xf32, #tpu.memory_space<smem>>
    %38 = tpu.iota {dimensions = array<i32: 1>} : vector<2x256xi32>
    %c16_i32 = arith.constant 16 : i32
    %c0_i32 = arith.constant 0 : i32
    %39 = arith.cmpi eq, %c16_i32, %c0_i32 : i32
    %c1_i32 = arith.constant 1 : i32
    %40 = arith.select %39, %c1_i32, %c16_i32 : i32
    %41 = vector.broadcast %40 : i32 to vector<2x256xi32>
    %42 = arith.remsi %38, %41 : vector<2x256xi32>
    %c0_i32_6 = arith.constant 0 : i32
    %43 = vector.broadcast %c0_i32_6 : i32 to vector<2x256xi32>
    %44 = arith.cmpi ne, %42, %43 : vector<2x256xi32>
    %c0_i32_7 = arith.constant 0 : i32
    %45 = vector.broadcast %c0_i32_7 : i32 to vector<2x256xi32>
    %46 = arith.cmpi slt, %42, %45 : vector<2x256xi32>
    %c0_i32_8 = arith.constant 0 : i32
    %47 = arith.cmpi slt, %40, %c0_i32_8 : i32
    %48 = vector.broadcast %47 : i1 to vector<2x256xi1>
    %49 = vector.broadcast %48 : vector<2x256xi1> to vector<2x256xi1>
    %50 = arith.xori %46, %49 : vector<2x256xi1>
    %51 = arith.andi %50, %44 : vector<2x256xi1>
    %52 = vector.broadcast %40 : i32 to vector<2x256xi32>
    %53 = arith.addi %42, %52 : vector<2x256xi32>
    %54 = arith.select %51, %53, %42 : vector<2x256xi1>, vector<2x256xi32>
    %c16_i32_9 = arith.constant 16 : i32
    %55 = vector.broadcast %c16_i32_9 : i32 to vector<2x256xi32>
    %56 = arith.cmpi sge, %38, %55 : vector<2x256xi32>
    %c1_i32_10 = arith.constant 1 : i32
    %57 = vector.broadcast %c1_i32_10 : i32 to vector<2x256xi32>
    %58 = arith.cmpi sge, %54, %57 : vector<2x256xi32>
    %59 = arith.andi %56, %58 : vector<2x256xi1>
    %c16_i32_11 = arith.constant 16 : i32
    %60 = vector.broadcast %c16_i32_11 : i32 to vector<2x256xi32>
    %61 = arith.cmpi sge, %38, %60 : vector<2x256xi32>
    %c16_i32_12 = arith.constant 16 : i32
    %62 = vector.broadcast %c16_i32_12 : i32 to vector<2x256xi32>
    %63 = arith.cmpi sge, %38, %62 : vector<2x256xi32>
    %c15_i32 = arith.constant 15 : i32
    %64 = vector.broadcast %c15_i32 : i32 to vector<2x256xi32>
    %65 = arith.cmpi slt, %54, %64 : vector<2x256xi32>
    %66 = arith.andi %63, %65 : vector<2x256xi1>
    %c1_i32_13 = arith.constant 1 : i32
    %67 = vector.broadcast %c1_i32_13 : i32 to vector<2x256xi32>
    %68 = arith.cmpi sge, %54, %67 : vector<2x256xi32>
    %c15_i32_14 = arith.constant 15 : i32
    %69 = vector.broadcast %c15_i32_14 : i32 to vector<2x256xi32>
    %70 = arith.cmpi slt, %54, %69 : vector<2x256xi32>
    %c240_i32 = arith.constant 240 : i32
    %71 = vector.broadcast %c240_i32 : i32 to vector<2x256xi32>
    %72 = arith.cmpi slt, %38, %71 : vector<2x256xi32>
    %c1_i32_15 = arith.constant 1 : i32
    %73 = vector.broadcast %c1_i32_15 : i32 to vector<2x256xi32>
    %74 = arith.cmpi sge, %54, %73 : vector<2x256xi32>
    %75 = arith.andi %72, %74 : vector<2x256xi1>
    %c240_i32_16 = arith.constant 240 : i32
    %76 = vector.broadcast %c240_i32_16 : i32 to vector<2x256xi32>
    %77 = arith.cmpi slt, %38, %76 : vector<2x256xi32>
    %c240_i32_17 = arith.constant 240 : i32
    %78 = vector.broadcast %c240_i32_17 : i32 to vector<2x256xi32>
    %79 = arith.cmpi slt, %38, %78 : vector<2x256xi32>
    %c15_i32_18 = arith.constant 15 : i32
    %80 = vector.broadcast %c15_i32_18 : i32 to vector<2x256xi32>
    %81 = arith.cmpi slt, %54, %80 : vector<2x256xi32>
    %82 = arith.andi %79, %81 : vector<2x256xi1>
    %c0_19 = arith.constant 0 : index
    %c2_20 = arith.constant 2 : index
    %c0_21 = arith.constant 0 : index
    %83 = vector.load %arg1[%c0_19, %c2_20, %c0_21] : memref<2x4x256xf32, #tpu.memory_space<vmem>>, vector<2x2x256xf32>
    %cst = arith.constant 0.000000e+00 : f32
    %84 = vector.broadcast %cst : f32 to vector<2x256xf32>
    %cst_22 = arith.constant 0.000000e+00 : f32
    %85 = vector.broadcast %cst_22 : f32 to vector<2x256xf32>
    %86 = vector.extract_strided_slice %83 {offsets = [0, 0, 0], sizes = [2, 1, 256], strides = [1, 1, 1]} : vector<2x2x256xf32> to vector<2x1x256xf32>
    %87 = vector.shape_cast %86 : vector<2x1x256xf32> to vector<2x256xf32>
    %c17_i32 = arith.constant 17 : i32
    %88 = tpu.dynamic_rotate %87 by %c17_i32 dim 1 : vector<2x256xf32>, i32 -> vector<2x256xf32>
    %cst_23 = arith.constant 0.000000e+00 : f32
    %89 = vector.broadcast %cst_23 : f32 to vector<2x256xf32>
    %90 = arith.select %59, %88, %89 : vector<2x256xi1>, vector<2x256xf32>
    %91 = vector.broadcast %2 : f32 to vector<2x256xf32>
    %92 = arith.mulf %91, %90 : vector<2x256xf32>
    %93 = arith.addf %84, %92 : vector<2x256xf32>
    %94 = vector.broadcast %20 : f32 to vector<2x256xf32>
    %95 = arith.mulf %94, %90 : vector<2x256xf32>
    %96 = arith.addf %85, %95 : vector<2x256xf32>
    %c16_i32_24 = arith.constant 16 : i32
    %97 = tpu.dynamic_rotate %87 by %c16_i32_24 dim 1 : vector<2x256xf32>, i32 -> vector<2x256xf32>
    %cst_25 = arith.constant 0.000000e+00 : f32
    %98 = vector.broadcast %cst_25 : f32 to vector<2x256xf32>
    %99 = arith.select %61, %97, %98 : vector<2x256xi1>, vector<2x256xf32>
    %100 = vector.broadcast %3 : f32 to vector<2x256xf32>
    %101 = arith.mulf %100, %99 : vector<2x256xf32>
    %102 = arith.addf %93, %101 : vector<2x256xf32>
    %103 = vector.broadcast %21 : f32 to vector<2x256xf32>
    %104 = arith.mulf %103, %99 : vector<2x256xf32>
    %105 = arith.addf %96, %104 : vector<2x256xf32>
    %c15_i32_26 = arith.constant 15 : i32
    %106 = tpu.dynamic_rotate %87 by %c15_i32_26 dim 1 : vector<2x256xf32>, i32 -> vector<2x256xf32>
    %cst_27 = arith.constant 0.000000e+00 : f32
    %107 = vector.broadcast %cst_27 : f32 to vector<2x256xf32>
    %108 = arith.select %66, %106, %107 : vector<2x256xi1>, vector<2x256xf32>
    %109 = vector.broadcast %4 : f32 to vector<2x256xf32>
    %110 = arith.mulf %109, %108 : vector<2x256xf32>
    %111 = arith.addf %102, %110 : vector<2x256xf32>
    %112 = vector.broadcast %22 : f32 to vector<2x256xf32>
    %113 = arith.mulf %112, %108 : vector<2x256xf32>
    %114 = arith.addf %105, %113 : vector<2x256xf32>
    %c1_i32_28 = arith.constant 1 : i32
    %115 = tpu.dynamic_rotate %87 by %c1_i32_28 dim 1 : vector<2x256xf32>, i32 -> vector<2x256xf32>
    %cst_29 = arith.constant 0.000000e+00 : f32
    %116 = vector.broadcast %cst_29 : f32 to vector<2x256xf32>
    %117 = arith.select %68, %115, %116 : vector<2x256xi1>, vector<2x256xf32>
    %118 = vector.broadcast %5 : f32 to vector<2x256xf32>
    %119 = arith.mulf %118, %117 : vector<2x256xf32>
    %120 = arith.addf %111, %119 : vector<2x256xf32>
    %121 = vector.broadcast %23 : f32 to vector<2x256xf32>
    %122 = arith.mulf %121, %117 : vector<2x256xf32>
    %123 = arith.addf %114, %122 : vector<2x256xf32>
    %124 = vector.broadcast %6 : f32 to vector<2x256xf32>
    %125 = arith.mulf %124, %87 : vector<2x256xf32>
    %126 = arith.addf %120, %125 : vector<2x256xf32>
    %127 = vector.broadcast %24 : f32 to vector<2x256xf32>
    %128 = arith.mulf %127, %87 : vector<2x256xf32>
    %129 = arith.addf %123, %128 : vector<2x256xf32>
    %c255_i32 = arith.constant 255 : i32
    %130 = tpu.dynamic_rotate %87 by %c255_i32 dim 1 : vector<2x256xf32>, i32 -> vector<2x256xf32>
    %cst_30 = arith.constant 0.000000e+00 : f32
    %131 = vector.broadcast %cst_30 : f32 to vector<2x256xf32>
    %132 = arith.select %70, %130, %131 : vector<2x256xi1>, vector<2x256xf32>
    %133 = vector.broadcast %7 : f32 to vector<2x256xf32>
    %134 = arith.mulf %133, %132 : vector<2x256xf32>
    %135 = arith.addf %126, %134 : vector<2x256xf32>
    %136 = vector.broadcast %25 : f32 to vector<2x256xf32>
    %137 = arith.mulf %136, %132 : vector<2x256xf32>
    %138 = arith.addf %129, %137 : vector<2x256xf32>
    %c241_i32 = arith.constant 241 : i32
    %139 = tpu.dynamic_rotate %87 by %c241_i32 dim 1 : vector<2x256xf32>, i32 -> vector<2x256xf32>
    %cst_31 = arith.constant 0.000000e+00 : f32
    %140 = vector.broadcast %cst_31 : f32 to vector<2x256xf32>
    %141 = arith.select %75, %139, %140 : vector<2x256xi1>, vector<2x256xf32>
    %142 = vector.broadcast %8 : f32 to vector<2x256xf32>
    %143 = arith.mulf %142, %141 : vector<2x256xf32>
    %144 = arith.addf %135, %143 : vector<2x256xf32>
    %145 = vector.broadcast %26 : f32 to vector<2x256xf32>
    %146 = arith.mulf %145, %141 : vector<2x256xf32>
    %147 = arith.addf %138, %146 : vector<2x256xf32>
    %c240_i32_32 = arith.constant 240 : i32
    %148 = tpu.dynamic_rotate %87 by %c240_i32_32 dim 1 : vector<2x256xf32>, i32 -> vector<2x256xf32>
    %cst_33 = arith.constant 0.000000e+00 : f32
    %149 = vector.broadcast %cst_33 : f32 to vector<2x256xf32>
    %150 = arith.select %77, %148, %149 : vector<2x256xi1>, vector<2x256xf32>
    %151 = vector.broadcast %9 : f32 to vector<2x256xf32>
    %152 = arith.mulf %151, %150 : vector<2x256xf32>
    %153 = arith.addf %144, %152 : vector<2x256xf32>
    %154 = vector.broadcast %27 : f32 to vector<2x256xf32>
    %155 = arith.mulf %154, %150 : vector<2x256xf32>
    %156 = arith.addf %147, %155 : vector<2x256xf32>
    %c239_i32 = arith.constant 239 : i32
    %157 = tpu.dynamic_rotate %87 by %c239_i32 dim 1 : vector<2x256xf32>, i32 -> vector<2x256xf32>
    %cst_34 = arith.constant 0.000000e+00 : f32
    %158 = vector.broadcast %cst_34 : f32 to vector<2x256xf32>
    %159 = arith.select %82, %157, %158 : vector<2x256xi1>, vector<2x256xf32>
    %160 = vector.broadcast %10 : f32 to vector<2x256xf32>
    %161 = arith.mulf %160, %159 : vector<2x256xf32>
    %162 = arith.addf %153, %161 : vector<2x256xf32>
    %163 = vector.broadcast %28 : f32 to vector<2x256xf32>
    %164 = arith.mulf %163, %159 : vector<2x256xf32>
    %165 = arith.addf %156, %164 : vector<2x256xf32>
    %166 = vector.extract_strided_slice %83 {offsets = [0, 1, 0], sizes = [2, 1, 256], strides = [1, 1, 1]} : vector<2x2x256xf32> to vector<2x1x256xf32>
    %167 = vector.shape_cast %166 : vector<2x1x256xf32> to vector<2x256xf32>
    %c17_i32_35 = arith.constant 17 : i32
    %168 = tpu.dynamic_rotate %167 by %c17_i32_35 dim 1 : vector<2x256xf32>, i32 -> vector<2x256xf32>
    %cst_36 = arith.constant 0.000000e+00 : f32
    %169 = vector.broadcast %cst_36 : f32 to vector<2x256xf32>
    %170 = arith.select %59, %168, %169 : vector<2x256xi1>, vector<2x256xf32>
    %171 = vector.broadcast %11 : f32 to vector<2x256xf32>
    %172 = arith.mulf %171, %170 : vector<2x256xf32>
    %173 = arith.addf %162, %172 : vector<2x256xf32>
    %174 = vector.broadcast %29 : f32 to vector<2x256xf32>
    %175 = arith.mulf %174, %170 : vector<2x256xf32>
    %176 = arith.addf %165, %175 : vector<2x256xf32>
    %c16_i32_37 = arith.constant 16 : i32
    %177 = tpu.dynamic_rotate %167 by %c16_i32_37 dim 1 : vector<2x256xf32>, i32 -> vector<2x256xf32>
    %cst_38 = arith.constant 0.000000e+00 : f32
    %178 = vector.broadcast %cst_38 : f32 to vector<2x256xf32>
    %179 = arith.select %61, %177, %178 : vector<2x256xi1>, vector<2x256xf32>
    %180 = vector.broadcast %12 : f32 to vector<2x256xf32>
    %181 = arith.mulf %180, %179 : vector<2x256xf32>
    %182 = arith.addf %173, %181 : vector<2x256xf32>
    %183 = vector.broadcast %30 : f32 to vector<2x256xf32>
    %184 = arith.mulf %183, %179 : vector<2x256xf32>
    %185 = arith.addf %176, %184 : vector<2x256xf32>
    %c15_i32_39 = arith.constant 15 : i32
    %186 = tpu.dynamic_rotate %167 by %c15_i32_39 dim 1 : vector<2x256xf32>, i32 -> vector<2x256xf32>
    %cst_40 = arith.constant 0.000000e+00 : f32
    %187 = vector.broadcast %cst_40 : f32 to vector<2x256xf32>
    %188 = arith.select %66, %186, %187 : vector<2x256xi1>, vector<2x256xf32>
    %189 = vector.broadcast %13 : f32 to vector<2x256xf32>
    %190 = arith.mulf %189, %188 : vector<2x256xf32>
    %191 = arith.addf %182, %190 : vector<2x256xf32>
    %192 = vector.broadcast %31 : f32 to vector<2x256xf32>
    %193 = arith.mulf %192, %188 : vector<2x256xf32>
    %194 = arith.addf %185, %193 : vector<2x256xf32>
    %c1_i32_41 = arith.constant 1 : i32
    %195 = tpu.dynamic_rotate %167 by %c1_i32_41 dim 1 : vector<2x256xf32>, i32 -> vector<2x256xf32>
    %cst_42 = arith.constant 0.000000e+00 : f32
    %196 = vector.broadcast %cst_42 : f32 to vector<2x256xf32>
    %197 = arith.select %68, %195, %196 : vector<2x256xi1>, vector<2x256xf32>
    %198 = vector.broadcast %14 : f32 to vector<2x256xf32>
    %199 = arith.mulf %198, %197 : vector<2x256xf32>
    %200 = arith.addf %191, %199 : vector<2x256xf32>
    %201 = vector.broadcast %32 : f32 to vector<2x256xf32>
    %202 = arith.mulf %201, %197 : vector<2x256xf32>
    %203 = arith.addf %194, %202 : vector<2x256xf32>
    %204 = vector.broadcast %15 : f32 to vector<2x256xf32>
    %205 = arith.mulf %204, %167 : vector<2x256xf32>
    %206 = arith.addf %200, %205 : vector<2x256xf32>
    %207 = vector.broadcast %33 : f32 to vector<2x256xf32>
    %208 = arith.mulf %207, %167 : vector<2x256xf32>
    %209 = arith.addf %203, %208 : vector<2x256xf32>
    %c255_i32_43 = arith.constant 255 : i32
    %210 = tpu.dynamic_rotate %167 by %c255_i32_43 dim 1 : vector<2x256xf32>, i32 -> vector<2x256xf32>
    %cst_44 = arith.constant 0.000000e+00 : f32
    %211 = vector.broadcast %cst_44 : f32 to vector<2x256xf32>
    %212 = arith.select %70, %210, %211 : vector<2x256xi1>, vector<2x256xf32>
    %213 = vector.broadcast %16 : f32 to vector<2x256xf32>
    %214 = arith.mulf %213, %212 : vector<2x256xf32>
    %215 = arith.addf %206, %214 : vector<2x256xf32>
    %216 = vector.broadcast %34 : f32 to vector<2x256xf32>
    %217 = arith.mulf %216, %212 : vector<2x256xf32>
    %218 = arith.addf %209, %217 : vector<2x256xf32>
    %c241_i32_45 = arith.constant 241 : i32
    %219 = tpu.dynamic_rotate %167 by %c241_i32_45 dim 1 : vector<2x256xf32>, i32 -> vector<2x256xf32>
    %cst_46 = arith.constant 0.000000e+00 : f32
    %220 = vector.broadcast %cst_46 : f32 to vector<2x256xf32>
    %221 = arith.select %75, %219, %220 : vector<2x256xi1>, vector<2x256xf32>
    %222 = vector.broadcast %17 : f32 to vector<2x256xf32>
    %223 = arith.mulf %222, %221 : vector<2x256xf32>
    %224 = arith.addf %215, %223 : vector<2x256xf32>
    %225 = vector.broadcast %35 : f32 to vector<2x256xf32>
    %226 = arith.mulf %225, %221 : vector<2x256xf32>
    %227 = arith.addf %218, %226 : vector<2x256xf32>
    %c240_i32_47 = arith.constant 240 : i32
    %228 = tpu.dynamic_rotate %167 by %c240_i32_47 dim 1 : vector<2x256xf32>, i32 -> vector<2x256xf32>
    %cst_48 = arith.constant 0.000000e+00 : f32
    %229 = vector.broadcast %cst_48 : f32 to vector<2x256xf32>
    %230 = arith.select %77, %228, %229 : vector<2x256xi1>, vector<2x256xf32>
    %231 = vector.broadcast %18 : f32 to vector<2x256xf32>
    %232 = arith.mulf %231, %230 : vector<2x256xf32>
    %233 = arith.addf %224, %232 : vector<2x256xf32>
    %234 = vector.broadcast %36 : f32 to vector<2x256xf32>
    %235 = arith.mulf %234, %230 : vector<2x256xf32>
    %236 = arith.addf %227, %235 : vector<2x256xf32>
    %c239_i32_49 = arith.constant 239 : i32
    %237 = tpu.dynamic_rotate %167 by %c239_i32_49 dim 1 : vector<2x256xf32>, i32 -> vector<2x256xf32>
    %cst_50 = arith.constant 0.000000e+00 : f32
    %238 = vector.broadcast %cst_50 : f32 to vector<2x256xf32>
    %239 = arith.select %82, %237, %238 : vector<2x256xi1>, vector<2x256xf32>
    %240 = vector.broadcast %19 : f32 to vector<2x256xf32>
    %241 = arith.mulf %240, %239 : vector<2x256xf32>
    %242 = arith.addf %233, %241 : vector<2x256xf32>
    %243 = vector.broadcast %37 : f32 to vector<2x256xf32>
    %244 = arith.mulf %243, %239 : vector<2x256xf32>
    %245 = arith.addf %236, %244 : vector<2x256xf32>
    %246 = vector.shape_cast %242 : vector<2x256xf32> to vector<2x1x256xf32>
    %247 = vector.shape_cast %245 : vector<2x256xf32> to vector<2x1x256xf32>
    %248 = tpu.concatenate %246, %247 in 1 : vector<2x1x256xf32>, vector<2x1x256xf32> -> vector<2x2x256xf32>
    %c0_51 = arith.constant 0 : index
    %c2_52 = arith.constant 2 : index
    %c0_53 = arith.constant 0 : index
    %249 = vector.load %arg2[%c0_51, %c2_52, %c0_53] : memref<2x4x256xf32, #tpu.memory_space<vmem>>, vector<2x2x256xf32>
    tpu.vector_store %arg2[%c0_51, %c2_52, %c0_53], %248 {strides = array<i32>} : memref<2x4x256xf32, #tpu.memory_space<vmem>>, vector<2x2x256xf32>,
    return
  }
}

</mosaic_0001>

<bundles_post_ra>
// kernel: tpu_custom_call.1
= control target key start
LH: loop header
LB: loop body
LE: loop exit
PB: predicated region body
PF: predicated region fallthrough
CT: control target
= control target key end

     0   :  { %7 = vsyncpa [#allocation5], 0  ;;  %s1221_s0 = inlined_call_operand.hbm [shape: f32[36], index: 0, kind: input, shape index: {}]   ;;  %s1222_s1 = inlined_call_operand.hbm [shape: f32[2,4,256], index: 1, kind: input, shape index: {}]   ;;  %s1223_s2 = inlined_call_operand.hbm [shape: f32[2,4,256], index: 2, kind: output, shape index: {}]  }
   0x1   :  { %8 = vsyncpa [#allocation3], 0 }
   0x2   :  { %9 = vsyncpa [#allocation4], 0  ;;  %s797_s9 = smov [#allocation2]   ;;  %s798_s12 = smov [#allocation6]  }
   0x3   :  { %17 = dma.hbm_to_smem %s1221_s0, 16, %s797_s9, [#allocation5]  }
   0x4   :  { %s23_s13 = sshll.u32 %s798_s12, 4  ;;  %s24_s13 = int_to_ptr.vmem [resolvable:$true] %s23_s13 }
   0x5   :  { %s759_s14 = scalar_lea.vmem %s24_s13, 256  ;;  %p764_p1 = scmp.lt.s32.totalorder %s24_s13, %s24_s13 }
   0x6   :  { %p760_p0 = scmp.ne.s32.totalorder %s24_s13, %s759_s14  ;;  %p765_p2 = scmp.lt.s32.totalorder %s759_s14, %s759_s14 }
   0x8   :  { %p766_p3 = por %p765_p2, %p764_p1 }
   0xa   :  { %p767_p4 = pnand %p766_p3, %p760_p0 }
   0xc   :  { %770 = shalt.err (!%p767_p4)
}
   0xd   :  { %s799_s15 = smov 128   ;;  %s800_s16 = smov 8  }
   0xe   :  { %29 = dma.hbm_to_vmem [thread:$0]  %s1222_s1, 256, %s24_s13, [#allocation3], %s799_s15, %s799_s15, %s800_s16  }
   0xf   :  { %791 = dma.done.wait [#allocation5], 16  }
  0x10   :  { %792 = vsyncadd [#allocation5], 4294967280 }
  0x11   :  { %793 = dma.done.wait [#allocation3], 256  }
  0x12   :  { %794 = vsyncadd [#allocation3], 4294967040 }
  0x13   :  { %36 = sfence }
  0x14   :  { %v77_v0 = vlaneseq  ;;  %v838_v2 = vld [vmem:[#allocation6] sm:$0xcc]  ;;  %v840_v3 = vld [vmem:[#allocation6 + $0x8] sm:$0xcc]  ;;  %vm140_vm0 = vcmask 1041409   ;;  %s801_s0 = smov 16  }
  0x15   :  { %s802_s1 = smov 17   ;;  %s697_s19 = sld [smem:[#allocation2 + $0x4]]  ;;  %v37_v56 = vld [vmem:[#allocation6] sm:$0x33]  ;;  %v38_v57 = vld [vmem:[#allocation6 + $0x8] sm:$0x33] }
  0x16   :  { %v836_v1 = vshrl.u32 %v77_v0, 7  ;;  %s715_s20 = sld [smem:[#allocation2 + $0x16]]  ;;  %s803_s21 = smov 15   ;;  %39 = vst [vmem:[#allocation7] sm:$0x33] %v37_v56  ;;  %v923_v58 = vand.u32 127, %v77_v0 }
  0x17   :  { %s804_s22 = smov 1   ;;  %s805_s23 = smov 127   ;;  %40 = vst [vmem:[#allocation7 + $0x8] sm:$0x33] %v38_v57 }
  0x18   :  { %v126_v4 = vsub.s32 2, %v836_v1  ;;  %v130_v5 = vsub.s32 6, %v836_v1  ;;  %s806_s24 = smov 113   ;;  %v357_v30 = vsub.s32 7, %v836_v1  ;;  %v353_v31 = vsub.s32 3, %v836_v1  ;;  %s807_s25 = smov 112  }
  0x19   :  { %s706_s26 = sld [smem:[#allocation2 + $0xd]]  ;;  %s808_s27 = smov 111   ;;  %v934_v59 = vadd.s32 128, %v923_v58  ;;  %v84_v60 = vand.u32 15, %v923_v58  ;;  %vm104_vm1 = vcmp.ge.s32.totalorder %v923_v58, 16  ;;  %vm168_vm3 = vcmp.lt.s32.totalorder %v923_v58, 16 }
  0x1a   :  { %v127_v6 = vrot.slane %v838_v2, %v126_v4  ;;  %v135_v7 = vrot.slane %v840_v3, %v126_v4  ;;  %v131_v8 = vrot.slane %v838_v2, %v130_v5  ;;  %v139_v9 = vrot.slane %v840_v3, %v130_v5  ;;  %s724_s28 = sld [smem:[#allocation2 + $0x1f]] }
  0x1b   :  { %v221_v12 = vstv %s697_s19  ;;  %v358_v32 = vrot.slane %v838_v2, %v357_v30  ;;  %v366_v33 = vrot.slane %v840_v3, %v357_v30  ;;  %v354_v34 = vrot.slane %v838_v2, %v353_v31  ;;  %s925_s29 = sld [smem:[#allocation2 + $0x1]] }
  0x1c   :  { %v141_v10 = vsel %vm140_vm0, %v135_v7, %v127_v6  ;;  %v142_v11 = vsel %vm140_vm0, %v139_v9, %v131_v8  ;;  %v222_v13 = vmul.f32 %v221_v12, %v838_v2  ;;  %v223_v14 = vmul.f32 %v221_v12, %v840_v3  ;;  %s927_s30 = sld [smem:[#allocation2 + $0x13]] }
  0x1d   :  { %164 = vrot.lane.b32.xlu1 %v141_v10, %s801_s0  ;;  %145 = vrot.lane.b32.xlu0 %v141_v10, %s802_s1  ;;  %v248_v15 = vstv %s715_s20  ;;  %v362_v35 = vrot.slane %v840_v3, %v353_v31  ;;  %v368_v36 = vsel %vm140_vm0, %v366_v33, %v358_v32  ;;  %s929_s3 = sld [smem:[#allocation2]]  ;;  %v91_v61 = vand.u32 15, %v934_v59 }
  0x1e   :  { %v229_v16 = vrot.slane %v222_v13, %v126_v4  ;;  %v233_v17 = vrot.slane %v222_v13, %v130_v5  ;;  %v237_v18 = vrot.slane %v223_v14, %v126_v4  ;;  %v241_v19 = vrot.slane %v223_v14, %v130_v5  ;;  %s931_s4 = sld [smem:[#allocation2 + $0x12]] }
  0x1f   :  { %v249_v20 = vmul.f32 %v248_v15, %v838_v2  ;;  %v250_v21 = vmul.f32 %v248_v15, %v840_v3  ;;  %v367_v37 = vsel %vm140_vm0, %v362_v35, %v354_v34  ;;  %v443_v38 = vstv %s706_s26  ;;  %s937_s5 = sld [smem:[#allocation2 + $0x2]] }
  0x20   :  { %v863_v22 = vsel %vm140_vm0, %v237_v18, %v229_v16  ;;  %v866_v23 = vsel %vm140_vm0, %v241_v19, %v233_v17  ;;  %v444_v39 = vmul.f32 %v443_v38, %v838_v2  ;;  %v445_v40 = vmul.f32 %v443_v38, %v840_v3  ;;  %s939_s6 = sld [smem:[#allocation2 + $0x14]] }
  0x21   :  { %166 = vrot.lane.b32.xlu1 %v142_v11, %s801_s0  ;;  %147 = vrot.lane.b32.xlu0 %v142_v11, %s802_s1  ;;  %v256_v24 = vrot.slane %v249_v20, %v126_v4  ;;  %v260_v25 = vrot.slane %v249_v20, %v130_v5  ;;  %v264_v26 = vrot.slane %v250_v21, %v126_v4  ;;  %v470_v44 = vstv %s724_s28  ;;  %s947_s7 = sld [smem:[#allocation2 + $0x3]] }
  0x22   :  { %v268_v27 = vrot.slane %v250_v21, %v130_v5  ;;  %v451_v41 = vrot.slane %v444_v39, %v353_v31  ;;  %v455_v42 = vrot.slane %v444_v39, %v357_v30  ;;  %v459_v43 = vrot.slane %v445_v40, %v353_v31  ;;  %s955_s8 = sld [smem:[#allocation2 + $0x15]] }
  0x23   :  { %v871_v28 = vsel %vm140_vm0, %v264_v26, %v256_v24  ;;  %v463_v45 = vrot.slane %v445_v40, %v357_v30  ;;  %v471_v46 = vmul.f32 %v470_v44, %v838_v2  ;;  %v472_v47 = vmul.f32 %v470_v44, %v840_v3  ;;  %s1007_s9 = sld [smem:[#allocation2 + $0x5]] }
  0x24   :  { %v874_v29 = vsel %vm140_vm0, %v268_v27, %v260_v25  ;;  %v899_v48 = vsel %vm140_vm0, %v459_v43, %v451_v41  ;;  %vm943_vm2 = vcmp.ge.s32.totalorder %v84_v60, 1  ;;  %vm149_vm4 = vcmp.lt.s32.totalorder %v923_v58, 17  ;;  %s1014_s10 = sld [smem:[#allocation2 + $0x17]] }
  0x25   :  { %185 = vrot.lane.b32.xlu1 %v142_v11, %s803_s21  ;;  %183 = vrot.lane.b32.xlu0 %v141_v10, %s803_s21  ;;  %v902_v49 = vsel %vm140_vm0, %v463_v45, %v455_v42  ;;  %v478_v50 = vrot.slane %v471_v46, %v353_v31  ;;  %v482_v51 = vrot.slane %v471_v46, %v357_v30  ;;  %vm951_vm5 = vcmp.lt.s32.totalorder %v84_v60, 15  ;;  %vm966_vm7 = vmand %vm104_vm1, %vm943_vm2  ;;  %s1022_s11 = sld [smem:[#allocation2 + $0x6]] }
  0x26   :  { %v486_v52 = vrot.slane %v472_v47, %v353_v31  ;;  %v490_v53 = vrot.slane %v472_v47, %v357_v30  ;;  %v173_v3 = vstv %s925_s29  ;;  %vm958_vm6 = vcmp.ge.s32.totalorder %v91_v61, 1  ;;  %vm998_vm10 = vmand %vm104_vm1, %vm951_vm5  ;;  %s1028_s12 = sld [smem:[#allocation2 + $0x18]] }
  0x27   :  { %vm970_vm8 = vcmp.lt.s32.totalorder %v91_v61, 15  ;;  %vm187_vm9 = vcmp.lt.s32.totalorder %v923_v58, 15  ;;  %v178_v8 = vstv %s927_s30  ;;  %v192_v12 = vstv %s937_s5  ;;  %s1030_s13 = sld [smem:[#allocation2 + $0x7]]  ;;  %s810_s5 = smov [#allocation7]  }
  0x28   :  { %v907_v54 = vsel %vm140_vm0, %v486_v52, %v478_v50  ;;  %v910_v55 = vsel %vm140_vm0, %v490_v53, %v482_v51  ;;  %v197_v20 = vstv %s939_s6  ;;  %vm206_vm11 = vcmp.lt.s32.totalorder %v923_v58, 1  ;;  %s1034_s14 = sld [smem:[#allocation2 + $0x19]]  ;;  %s681_s6 = sshll.u32 %s810_s5, 4  ;;  %s682_s6 = int_to_ptr.vmem [resolvable:$true] %s681_s6 }
  0x29   :  { %204 = vrot.lane.b32.xlu1 %v142_v11, %s804_s22  ;;  %202 = vrot.lane.b32.xlu0 %v141_v10, %s804_s22  ;;  %vm1225_vm12 = vcmp.lt.s32.totalorder %v923_v58, 127  ;;  %v211_v40 = vstv %s947_s7  ;;  %v216_v41 = vstv %s955_s8  ;;  %vm115_vm13 = vcmp.lt.s32.totalorder %v934_v59, 240  ;;  %s1042_s17 = sld [smem:[#allocation2 + $0x8]]  ;;  %s771_s7 = scalar_lea.vmem %s682_s6, 256 }
  0x2a   :  { %vm1224_vm14 = vcmp.lt.s32.totalorder %v923_v58, 113  ;;  %vm317_vm15 = vcmp.lt.s32.totalorder %v923_v58, 112  ;;  %s1053_s18 = sld [smem:[#allocation2 + $0x1a]]  ;;  %vm1059_vm0 = vmand %vm115_vm13, %vm958_vm6  ;;  %v621_v2 = vsub.s32 0, %v836_v1  ;;  %p772_p5 = scmp.ne.s32.totalorder %s682_s6, %s771_s7 }
  0x2b   :  { %s1093_s19 = sld [smem:[#allocation2 + $0xa]]  ;;  %p776_p6 = scmp.lt.s32.totalorder %s682_s6, %s682_s6 }
  0x2c   :  { %s1098_s20 = sld [smem:[#allocation2 + $0x1c]]  ;;  %p777_p7 = scmp.lt.s32.totalorder %s771_s7, %s771_s7 }
  0x2d   :  { %277 = vrot.lane.b32.xlu1 %v142_v11, %s805_s23  ;;  %275 = vrot.lane.b32.xlu0 %v141_v10, %s805_s23  ;;  %s1142_s26 = sld [smem:[#allocation2 + $0x20]] }
  0x2e   :  { %s1152_s28 = sld [smem:[#allocation2 + $0x21]]  ;;  %p778_p8 = por %p777_p7, %p776_p6 }
  0x2f   :  { %s1158_s29 = sld [smem:[#allocation2 + $0x10]] }
  0x30   :  { %s1164_s30 = sld [smem:[#allocation2 + $0x22]]  ;;  %p779_p9 = pnand %p778_p8, %p772_p5 }
  0x31   :  { %296 = vrot.lane.b32.xlu1 %v142_v11, %s806_s24  ;;  %294 = vrot.lane.b32.xlu0 %v141_v10, %s806_s24 }
  0x35   :  { %315 = vrot.lane.b32.xlu1 %v142_v11, %s807_s25  ;;  %313 = vrot.lane.b32.xlu0 %v141_v10, %s807_s25 }
  0x39   :  { %334 = vrot.lane.b32.xlu1 %v142_v11, %s808_s27  ;;  %332 = vrot.lane.b32.xlu0 %v141_v10, %s808_s27  ;;  %v154_v10 = vstv %s929_s3  ;;  %v159_v11 = vstv %s931_s4  ;;  %s1172_s3 = sld [smem:[#allocation2 + $0x11]] }
  0x3a   :  { %s1174_s4 = sld [smem:[#allocation2 + $0x23]] }
  0x3d   :  { %373 = vrot.lane.b32.xlu1 %v368_v36, %s802_s1  ;;  %371 = vrot.lane.b32.xlu0 %v367_v37, %s802_s1  ;;  %s1077_s1 = sld [smem:[#allocation2 + $0x1b]] }
  0x3f   :  { %v559_v0 = vstv %s1172_s3 }
  0x41   :  { %391 = vrot.lane.b32.xlu1 %v368_v36, %s801_s0  ;;  %389 = vrot.lane.b32.xlu0 %v367_v37, %s801_s0  ;;  %s1069_s0 = sld [smem:[#allocation2 + $0x9]] }
  0x45   :  { %409 = vrot.lane.b32.xlu1 %v368_v36, %s803_s21  ;;  %407 = vrot.lane.b32.xlu0 %v367_v37, %s803_s21  ;;  %s1108_s21 = sld [smem:[#allocation2 + $0xb]] }
  0x49   :  { %427 = vrot.lane.b32.xlu1 %v368_v36, %s804_s22  ;;  %425 = vrot.lane.b32.xlu0 %v367_v37, %s804_s22  ;;  %s1112_s22 = sld [smem:[#allocation2 + $0x1d]] }
  0x4d   :  { %499 = vrot.lane.b32.xlu1 %v368_v36, %s805_s23  ;;  %497 = vrot.lane.b32.xlu0 %v367_v37, %s805_s23  ;;  %s1122_s23 = sld [smem:[#allocation2 + $0xc]] }
  0x51   :  { %517 = vrot.lane.b32.xlu1 %v368_v36, %s806_s24  ;;  %515 = vrot.lane.b32.xlu0 %v367_v37, %s806_s24  ;;  %s1126_s24 = sld [smem:[#allocation2 + $0x1e]] }
  0x55   :  { %535 = vrot.lane.b32.xlu1 %v368_v36, %s807_s25  ;;  %533 = vrot.lane.b32.xlu0 %v367_v37, %s807_s25  ;;  %s1136_s25 = sld [smem:[#allocation2 + $0xe]] }
  0x59   :  { %553 = vrot.lane.b32.xlu1 %v368_v36, %s808_s27  ;;  %551 = vrot.lane.b32.xlu0 %v367_v37, %s808_s27  ;;  %s1148_s27 = sld [smem:[#allocation2 + $0xf]] }
  0x8f   :  { %v165_v62 = vpop.permute.xlu1 %164  ;;  %v146_v63 = vpop.permute.xlu0 %145 }
  0x93   :  { %v167_v7 = vpop.permute.xlu1 %166  ;;  %v148_v9 = vpop.permute.xlu0 %147 }
  0x94   :  { %v169_v13 = vsel %vm168_vm3, %v165_v62, %v167_v7  ;;  %v170_v14 = vsel %vm168_vm3, %v167_v7, %v165_v62  ;;  %v150_v15 = vsel %vm149_vm4, %v146_v63, %v148_v9  ;;  %v151_v16 = vsel %vm149_vm4, %v148_v9, %v146_v63 }
  0x95   :  { %v171_v17 = vsel %vm104_vm1, %v170_v14, 0.0  ;;  %v175_v18 = vmul.f32 %v173_v3, %v169_v13  ;;  %v152_v19 = vsel %vm966_vm7, %v151_v16, 0.0  ;;  %v153_v25 = vsel %vm958_vm6, %v150_v15, 0.0 }
  0x96   :  { %v174_v21 = vmul.f32 %v173_v3, %v171_v17  ;;  %v179_v24 = vmul.f32 %v178_v8, %v171_v17  ;;  %v155_v26 = vmul.f32 %v154_v10, %v152_v19  ;;  %v180_v30 = vmul.f32 %v178_v8, %v169_v13 }
  0x97   :  { %v156_v31 = vmul.f32 %v154_v10, %v153_v25  ;;  %v160_v32 = vmul.f32 %v159_v11, %v152_v19  ;;  %v161_v33 = vmul.f32 %v159_v11, %v153_v25  ;;  %v186_v34 = vpop.permute.xlu1 %185  ;;  %v184_v35 = vpop.permute.xlu0 %183 }
  0x98   :  { %v188_v36 = vsel %vm187_vm9, %v184_v35, %v186_v34  ;;  %v189_v37 = vsel %vm187_vm9, %v186_v34, %v184_v35  ;;  %v176_v38 = vadd.f32 %v174_v21, %v155_v26  ;;  %v289_v21 = vstv %s1014_s10 }
  0x99   :  { %v190_v39 = vsel %vm998_vm10, %v189_v37, 0.0  ;;  %v181_v42 = vadd.f32 %v179_v24, %v160_v32  ;;  %v191_v43 = vsel %vm970_vm8, %v188_v36, 0.0  ;;  %v177_v46 = vadd.f32 %v175_v18, %v156_v31 }
  0x9a   :  { %v193_v44 = vmul.f32 %v192_v12, %v190_v39  ;;  %v198_v45 = vmul.f32 %v197_v20, %v190_v39  ;;  %v182_v47 = vadd.f32 %v180_v30, %v161_v33  ;;  %v194_v50 = vmul.f32 %v192_v12, %v191_v43 }
  0x9b   :  { %v199_v51 = vmul.f32 %v197_v20, %v191_v43  ;;  %v205_v52 = vpop.permute.xlu1 %204  ;;  %v203_v53 = vpop.permute.xlu0 %202  ;;  %v284_v20 = vstv %s1007_s9  ;;  %v308_v39 = vstv %s1028_s12 }
  0x9c   :  { %v195_v56 = vadd.f32 %v193_v44, %v176_v38  ;;  %v200_v57 = vadd.f32 %v198_v45, %v181_v42  ;;  %v207_v60 = vsel %vm206_vm11, %v203_v53, %v205_v52  ;;  %v208_v61 = vsel %vm206_vm11, %v205_v52, %v203_v53 }
  0x9d   :  { %v196_v62 = vadd.f32 %v194_v50, %v177_v46  ;;  %v201_v63 = vadd.f32 %v199_v51, %v182_v47  ;;  %v209_v3 = vsel %vm943_vm2, %v208_v61, 0.0  ;;  %v210_v7 = vsel %vm958_vm6, %v207_v60, 0.0 }
  0x9e   :  { %v212_v8 = vmul.f32 %v211_v40, %v209_v3  ;;  %v213_v9 = vmul.f32 %v211_v40, %v210_v7  ;;  %v217_v10 = vmul.f32 %v216_v41, %v209_v3  ;;  %v218_v11 = vmul.f32 %v216_v41, %v210_v7 }
  0x9f   :  { %v278_v12 = vpop.permute.xlu1 %277  ;;  %v276_v13 = vpop.permute.xlu0 %275  ;;  %v303_v38 = vstv %s1022_s11  ;;  %v322_v50 = vstv %s1030_s13  ;;  %v327_v51 = vstv %s1034_s14 }
  0xa0   :  { %v214_v14 = vadd.f32 %v212_v8, %v195_v56  ;;  %v215_v15 = vadd.f32 %v213_v9, %v196_v62  ;;  %v219_v16 = vadd.f32 %v217_v10, %v200_v57  ;;  %v220_v17 = vadd.f32 %v218_v11, %v201_v63 }
  0xa1   :  { %v280_v18 = vsel %vm1225_vm12, %v276_v13, %v278_v12  ;;  %v281_v19 = vsel %vm1225_vm12, %v278_v12, %v276_v13  ;;  %v341_v62 = vstv %s1042_s17  ;;  %vm1089_vm12 = vmand %vm115_vm13, %vm970_vm8  ;;  %v625_v9 = vsub.s32 1, %v836_v1 }
  0xa2   :  { %v246_v24 = vadd.f32 %v863_v22, %v214_v14  ;;  %v247_v25 = vadd.f32 %v866_v23, %v215_v15  ;;  %v273_v26 = vadd.f32 %v871_v28, %v219_v16  ;;  %v274_v30 = vadd.f32 %v874_v29, %v220_v17 }
  0xa3   :  { %v282_v31 = vsel %vm951_vm5, %v280_v18, 0.0  ;;  %v283_v32 = vsel %vm970_vm8, %v281_v19, 0.0  ;;  %v297_v33 = vpop.permute.xlu1 %296  ;;  %v295_v34 = vpop.permute.xlu0 %294  ;;  %v346_v15 = vstv %s1053_s18 }
  0xa4   :  { %v285_v22 = vmul.f32 %v284_v20, %v282_v31  ;;  %v286_v23 = vmul.f32 %v284_v20, %v283_v32  ;;  %v290_v35 = vmul.f32 %v289_v21, %v282_v31  ;;  %v291_v28 = vmul.f32 %v289_v21, %v283_v32 }
  0xa5   :  { %v299_v36 = vsel %vm1224_vm14, %v295_v34, %v297_v33  ;;  %v300_v37 = vsel %vm1224_vm14, %v297_v33, %v295_v34  ;;  %vm336_vm14 = vcmp.lt.s32.totalorder %v923_v58, 111 }
  0xa6   :  { %v287_v40 = vadd.f32 %v285_v22, %v246_v24  ;;  %v288_v41 = vadd.f32 %v286_v23, %v247_v25  ;;  %v292_v42 = vadd.f32 %v290_v35, %v273_v26  ;;  %v293_v43 = vadd.f32 %v291_v28, %v274_v30 }
  0xa7   :  { %v301_v44 = vsel %vm943_vm2, %v299_v36, 0.0  ;;  %v302_v45 = vsel %vm1059_vm0, %v300_v37, 0.0  ;;  %v316_v46 = vpop.permute.xlu1 %315  ;;  %v314_v47 = vpop.permute.xlu0 %313  ;;  %v379_v35 = vstv %s1069_s0  ;;  %v384_v28 = vstv %s1077_s1 }
  0xa8   :  { %v304_v52 = vmul.f32 %v303_v38, %v301_v44  ;;  %v305_v53 = vmul.f32 %v303_v38, %v302_v45  ;;  %v309_v56 = vmul.f32 %v308_v39, %v301_v44  ;;  %v310_v57 = vmul.f32 %v308_v39, %v302_v45 }
  0xa9   :  { %v318_v60 = vsel %vm317_vm15, %v314_v47, %v316_v46  ;;  %v319_v61 = vsel %vm317_vm15, %v316_v46, %v314_v47 }
  0xaa   :  { %v306_v63 = vadd.f32 %v304_v52, %v287_v40  ;;  %v307_v3 = vadd.f32 %v305_v53, %v288_v41  ;;  %v311_v7 = vadd.f32 %v309_v56, %v292_v42  ;;  %v312_v8 = vadd.f32 %v310_v57, %v293_v43 }
  0xab   :  { %v321_v10 = vsel %vm115_vm13, %v319_v61, 0.0  ;;  %v323_v11 = vmul.f32 %v322_v50, %v318_v60  ;;  %v328_v12 = vmul.f32 %v327_v51, %v318_v60  ;;  %v335_v13 = vpop.permute.xlu1 %334  ;;  %v333_v14 = vpop.permute.xlu0 %332  ;;  %v397_v52 = vstv %s1093_s19 }
  0xac   :  { %v324_v16 = vmul.f32 %v322_v50, %v321_v10  ;;  %v329_v17 = vmul.f32 %v327_v51, %v321_v10  ;;  %v337_v18 = vsel %vm336_vm14, %v333_v14, %v335_v13  ;;  %v338_v19 = vsel %vm336_vm14, %v335_v13, %v333_v14 }
  0xad   :  { %v325_v20 = vadd.f32 %v323_v11, %v306_v63  ;;  %v330_v21 = vadd.f32 %v328_v12, %v311_v7  ;;  %v339_v24 = vsel %vm951_vm5, %v337_v18, 0.0  ;;  %v340_v25 = vsel %vm1089_vm12, %v338_v19, 0.0 }
  0xae   :  { %v326_v26 = vadd.f32 %v324_v16, %v307_v3  ;;  %v331_v30 = vadd.f32 %v329_v17, %v312_v8  ;;  %v342_v31 = vmul.f32 %v341_v62, %v339_v24  ;;  %v343_v32 = vmul.f32 %v341_v62, %v340_v25 }
  0xaf   :  { %v347_v33 = vmul.f32 %v346_v15, %v339_v24  ;;  %v348_v34 = vmul.f32 %v346_v15, %v340_v25  ;;  %v374_v22 = vpop.permute.xlu1 %373  ;;  %v372_v23 = vpop.permute.xlu0 %371  ;;  %v402_v53 = vstv %s1098_s20  ;;  %v415_v13 = vstv %s1108_s21 }
  0xb0   :  { %v344_v36 = vadd.f32 %v342_v31, %v325_v20  ;;  %v345_v37 = vadd.f32 %v343_v32, %v326_v26  ;;  %v375_v38 = vsel %vm149_vm4, %v372_v23, %v374_v22  ;;  %v376_v39 = vsel %vm149_vm4, %v374_v22, %v372_v23 }
  0xb1   :  { %v349_v40 = vadd.f32 %v347_v33, %v330_v21  ;;  %v350_v41 = vadd.f32 %v348_v34, %v331_v30  ;;  %v377_v42 = vsel %vm966_vm7, %v376_v39, 0.0  ;;  %v378_v43 = vsel %vm958_vm6, %v375_v38, 0.0 }
  0xb2   :  { %v380_v44 = vmul.f32 %v379_v35, %v377_v42  ;;  %v381_v45 = vmul.f32 %v379_v35, %v378_v43  ;;  %v385_v46 = vmul.f32 %v384_v28, %v377_v42  ;;  %v386_v47 = vmul.f32 %v384_v28, %v378_v43 }
  0xb3   :  { %v392_v50 = vpop.permute.xlu1 %391  ;;  %v390_v51 = vpop.permute.xlu0 %389  ;;  %v420_v14 = vstv %s1112_s22  ;;  %v433_v34 = vstv %s1122_s23  ;;  %v438_v22 = vstv %s1126_s24  ;;  %vm1244_vm4 = vcmp.lt.s32.totalorder %v923_v58, 113 }
  0xb4   :  { %v382_v56 = vadd.f32 %v380_v44, %v344_v36  ;;  %v383_v5 = vadd.f32 %v381_v45, %v345_v37  ;;  %v387_v57 = vadd.f32 %v385_v46, %v349_v40  ;;  %v388_v60 = vadd.f32 %v386_v47, %v350_v41 }
  0xb5   :  { %v393_v61 = vsel %vm168_vm3, %v390_v51, %v392_v50  ;;  %v394_v62 = vsel %vm168_vm3, %v392_v50, %v390_v51  ;;  %v505_v50 = vstv %s1136_s25  ;;  %v510_v51 = vstv %s1142_s26 }
  0xb6   :  { %v395_v63 = vsel %vm104_vm1, %v394_v62, 0.0  ;;  %v399_v3 = vmul.f32 %v397_v52, %v393_v61  ;;  %v404_v7 = vmul.f32 %v402_v53, %v393_v61  ;;  %vm1242_vm1 = vcmp.lt.s32.totalorder %v923_v58, 127 }
  0xb7   :  { %v398_v8 = vmul.f32 %v397_v52, %v395_v63  ;;  %v403_v10 = vmul.f32 %v402_v53, %v395_v63  ;;  %v410_v11 = vpop.permute.xlu1 %409  ;;  %v408_v12 = vpop.permute.xlu0 %407  ;;  %vm1243_vm3 = vmmov %vm1242_vm1 }
  0xb8   :  { %v401_v15 = vadd.f32 %v399_v3, %v383_v5  ;;  %v406_v16 = vadd.f32 %v404_v7, %v388_v60  ;;  %v411_v17 = vsel %vm187_vm9, %v408_v12, %v410_v11  ;;  %v412_v18 = vsel %vm187_vm9, %v410_v11, %v408_v12 }
  0xb9   :  { %v400_v19 = vadd.f32 %v398_v8, %v382_v56  ;;  %v405_v20 = vadd.f32 %v403_v10, %v387_v57  ;;  %v413_v21 = vsel %vm998_vm10, %v412_v18, 0.0  ;;  %v414_v24 = vsel %vm970_vm8, %v411_v17, 0.0 }
  0xba   :  { %v416_v25 = vmul.f32 %v415_v13, %v413_v21  ;;  %v417_v26 = vmul.f32 %v415_v13, %v414_v24  ;;  %v421_v30 = vmul.f32 %v420_v14, %v413_v21  ;;  %v422_v31 = vmul.f32 %v420_v14, %v414_v24 }
  0xbb   :  { %v428_v32 = vpop.permute.xlu1 %427  ;;  %v426_v33 = vpop.permute.xlu0 %425  ;;  %v523_v60 = vstv %s1148_s27  ;;  %v546_v21 = vstv %s1164_s30  ;;  %v809_v24 = vmov 1966171168  }
  0xbc   :  { %v418_v23 = vadd.f32 %v416_v25, %v400_v19  ;;  %v419_v35 = vadd.f32 %v417_v26, %v401_v15  ;;  %v423_v28 = vadd.f32 %v421_v30, %v405_v20  ;;  %v424_v36 = vadd.f32 %v422_v31, %v406_v16 }
  0xbd   :  { %v429_v27 = vsel %vm206_vm11, %v426_v33, %v428_v32  ;;  %v430_v37 = vsel %vm206_vm11, %v428_v32, %v426_v33  ;;  %v541_v15 = vstv %s1158_s29  ;;  %v573_v25 = vunpack.c.l.s4 %v809_v24 }
  0xbe   :  { %v431_v38 = vsel %vm943_vm2, %v430_v37, 0.0  ;;  %v432_v39 = vsel %vm958_vm6, %v429_v27, 0.0  ;;  %vm1245_vm6 = vmmov %vm1244_vm4 }
  0xbf   :  { %v434_v40 = vmul.f32 %v433_v34, %v431_v38  ;;  %v435_v41 = vmul.f32 %v433_v34, %v432_v39  ;;  %v439_v42 = vmul.f32 %v438_v22, %v431_v38  ;;  %v440_v43 = vmul.f32 %v438_v22, %v432_v39  ;;  %v500_v44 = vpop.permute.xlu1 %499  ;;  %v498_v45 = vpop.permute.xlu0 %497 }
  0xc0   :  { %v501_v46 = vsel %vm1242_vm1, %v498_v45, %v500_v44  ;;  %v502_v47 = vsel %vm1243_vm3, %v500_v44, %v498_v45  ;;  %v564_v22 = vstv %s1174_s4  ;;  %v574_v39 = vunpack.c.0.s8 %v573_v25 }
  0xc1   :  { %v436_v4 = vadd.f32 %v434_v40, %v418_v23  ;;  %v437_v52 = vadd.f32 %v435_v41, %v419_v35  ;;  %v441_v53 = vadd.f32 %v439_v42, %v423_v28  ;;  %v442_v56 = vadd.f32 %v440_v43, %v424_v36 }
  0xc2   :  { %v503_v5 = vsel %vm951_vm5, %v501_v46, 0.0  ;;  %v504_v57 = vsel %vm970_vm8, %v502_v47, 0.0 }
  0xc3   :  { %v468_v61 = vadd.f32 %v899_v48, %v436_v4  ;;  %v469_v62 = vadd.f32 %v902_v49, %v437_v52  ;;  %v495_v63 = vadd.f32 %v907_v54, %v441_v53  ;;  %v496_v3 = vadd.f32 %v910_v55, %v442_v56  ;;  %v518_v7 = vpop.permute.xlu1 %517  ;;  %v516_v8 = vpop.permute.xlu0 %515 }
  0xc4   :  { %v506_v10 = vmul.f32 %v505_v50, %v503_v5  ;;  %v507_v11 = vmul.f32 %v505_v50, %v504_v57  ;;  %v511_v12 = vmul.f32 %v510_v51, %v503_v5  ;;  %v512_v13 = vmul.f32 %v510_v51, %v504_v57 }
  0xc5   :  { %v519_v6 = vsel %vm1244_vm4, %v516_v8, %v518_v7  ;;  %v520_v14 = vsel %vm1245_vm6, %v518_v7, %v516_v8  ;;  %v528_v48 = vstv %s1152_s28  ;;  %v577_v5 = vsub.s32 %v574_v39, %v836_v1 }
  0xc6   :  { %v508_v49 = vadd.f32 %v506_v10, %v468_v61  ;;  %v509_v16 = vadd.f32 %v507_v11, %v469_v62  ;;  %v513_v54 = vadd.f32 %v511_v12, %v495_v63  ;;  %v514_v55 = vadd.f32 %v512_v13, %v496_v3 }
  0xc7   :  { %v521_v17 = vsel %vm943_vm2, %v519_v6, 0.0  ;;  %v522_v18 = vsel %vm1059_vm0, %v520_v14, 0.0  ;;  %v536_v19 = vpop.permute.xlu1 %535  ;;  %v534_v20 = vpop.permute.xlu0 %533  ;;  %vm659_vm2 = vcmask 1040384  }
  0xc8   :  { %v524_v26 = vmul.f32 %v523_v60, %v521_v17  ;;  %v525_v30 = vmul.f32 %v523_v60, %v522_v18  ;;  %v529_v31 = vmul.f32 %v528_v48, %v521_v17  ;;  %v530_v32 = vmul.f32 %v528_v48, %v522_v18 }
  0xc9   :  { %v537_v33 = vsel %vm317_vm15, %v534_v20, %v536_v19  ;;  %v538_v34 = vsel %vm317_vm15, %v536_v19, %v534_v20 }
  0xca   :  { %v526_v23 = vadd.f32 %v524_v26, %v508_v49  ;;  %v527_v29 = vadd.f32 %v525_v30, %v509_v16  ;;  %v531_v35 = vadd.f32 %v529_v31, %v513_v54  ;;  %v532_v28 = vadd.f32 %v530_v32, %v514_v55 }
  0xcb   :  { %v540_v36 = vsel %vm115_vm13, %v538_v34, 0.0  ;;  %v542_v27 = vmul.f32 %v541_v15, %v537_v33  ;;  %v547_v37 = vmul.f32 %v546_v21, %v537_v33  ;;  %v554_v38 = vpop.permute.xlu1 %553  ;;  %v552_v40 = vpop.permute.xlu0 %551 }
  0xcc   :  { %v543_v41 = vmul.f32 %v541_v15, %v540_v36  ;;  %v548_v42 = vmul.f32 %v546_v21, %v540_v36  ;;  %v555_v43 = vsel %vm336_vm14, %v552_v40, %v554_v38  ;;  %v556_v44 = vsel %vm336_vm14, %v554_v38, %v552_v40 }
  0xcd   :  { %v544_v45 = vadd.f32 %v542_v27, %v526_v23  ;;  %v549_v46 = vadd.f32 %v547_v37, %v531_v35  ;;  %v557_v47 = vsel %vm951_vm5, %v555_v43, 0.0  ;;  %v558_v59 = vsel %vm1089_vm12, %v556_v44, 0.0 }
  0xce   :  { %v545_v50 = vadd.f32 %v543_v41, %v527_v29  ;;  %v550_v51 = vadd.f32 %v548_v42, %v532_v28  ;;  %v560_v4 = vmul.f32 %v559_v0, %v557_v47  ;;  %v561_v52 = vmul.f32 %v559_v0, %v558_v59 }
  0xcf   :  { %v565_v53 = vmul.f32 %v564_v22, %v557_v47  ;;  %v566_v56 = vmul.f32 %v564_v22, %v558_v59 }
  0xd0   :  { %v562_v57 = vadd.f32 %v560_v4, %v544_v45  ;;  %v563_v60 = vadd.f32 %v561_v52, %v545_v50 }
  0xd1   :  { %v567_v58 = vadd.f32 %v565_v53, %v549_v46  ;;  %v568_v61 = vadd.f32 %v566_v56, %v550_v51 }
  0xd2   :  { %v571_v62 = vcombine.low %v562_v57, %v563_v60 }
  0xd3   :  { %v596_v63 = vcombine.low %v567_v58, %v568_v61 }
  0xd4   :  { %v578_v3 = vrot.slane %v571_v62, %v577_v5 }
  0xd5   :  { %v603_v7 = vrot.slane %v596_v63, %v577_v5 }
  0xd6   :  { %v579_v8 = vcombine.high %v578_v3, %v578_v3  ;;  %v586_v10 = vrot.slane %v578_v3, %v577_v5 }
  0xd7   :  { %v604_v11 = vcombine.high %v603_v7, %v603_v7  ;;  %v611_v12 = vrot.slane %v603_v7, %v577_v5 }
  0xd8   :  { %v593_v13 = vrot.slane %v579_v8, %v577_v5  ;;  %v622_v6 = vrot.slane %v586_v10, %v621_v2  ;;  %v626_v14 = vrot.slane %v586_v10, %v625_v9 }
  0xd9   :  { %v618_v48 = vrot.slane %v604_v11, %v577_v5  ;;  %v642_v15 = vrot.slane %v611_v12, %v621_v2  ;;  %v646_v49 = vrot.slane %v611_v12, %v625_v9 }
  0xda   :  { %v630_v16 = vrot.slane %v593_v13, %v621_v2  ;;  %v634_v54 = vrot.slane %v593_v13, %v625_v9 }
  0xdb   :  { %v650_v55 = vrot.slane %v618_v48, %v621_v2  ;;  %v654_v17 = vrot.slane %v618_v48, %v625_v9  ;;  %v660_v18 = vsel %vm659_vm2, %v622_v6, %v642_v15  ;;  %v661_v19 = vsel %vm659_vm2, %v626_v14, %v646_v49 }
  0xdc   :  { %v668_v20 = vcombine.low %v660_v18, %v661_v19 }
  0xdd   :  { %v662_v1 = vsel %vm659_vm2, %v630_v16, %v650_v55  ;;  %v663_v21 = vsel %vm659_vm2, %v634_v54, %v654_v17 }
  0xde   :  { %v669_v24 = vcombine.low %v662_v1, %v663_v21  ;;  %v670_v25 = vrot.slane %v668_v20, 6 }
  0xe0   :  { %v671_v26 = vrot.slane %v669_v24, 6  ;;  %674 = vst [vmem:[#allocation7] sm:$0xcc] %v670_v25 }
  0xe2   :  { %675 = vst [vmem:[#allocation7 + $0x8] sm:$0xcc] %v671_v26 }
  0xe3   :  { %782 = shalt.err (!%p779_p9)
}
  0xe4   :  { %687 = dma.vmem_to_hbm [thread:$0]  %s682_s6, 256, %s1223_s2, [#allocation4], %s799_s15, %s799_s15, %s800_s16  }
  0xe5   :  { %795 = dma.done.wait [#allocation4], 256  }
  0xe6   :  { %796 = vsyncadd [#allocation4], 4294967040 }
  0xe7   :  { %691 = vsyncpa [#allocation3], 1 }
  0xe8   :  { %692 = vsyncpa [#allocation4], 1 }
  0xe9   :  { %693 = vsyncpa [#allocation5], 1 }

</bundles_post_ra>
